<compile_context>
chip_gen: v7x
topology: tpu7x:2x2x1
jax: 0.10.0
libtpu: 0.0.40
codegen_flags: <defaults>
</compile_context>

<pallas_src>
from functools import partial

import jax
import jax.numpy as jnp
from jax import lax
from jax.experimental import pallas as pl
from jax.experimental.pallas import tpu as pltpu


def _agent_mask_pool_kernel(
    x_ref,       # (tile_l, D)  VMEM, one L-tile of one batch (native dtype)
    mask_ref,    # (Q, tile_l)  VMEM, L-last (lane-dense)
    gamma_ref,   # (1, D)       VMEM, LayerNorm weight (resident)
    beta_ref,    # (1, D)       VMEM, LayerNorm bias   (resident)
    w_ref,       # (D, D)       VMEM, Linear weight pre-transposed to (in, out)
    b_ref,       # (1, D)       VMEM, Linear bias
    out_ref,     # (Q, D)       VMEM, resident across the L axis
    acc_ref,     # (Q, D) f32   scratch: un-normalized pooled sums
    den_ref,     # (Q, 1) f32   scratch: per-agent mask counts
    *,
    seq_len: int,
    tile_l: int,
    mask_tail: bool,
    denorm_eps: float,
    ln_eps: float,
):
    l = pl.program_id(1)
    n_l = pl.num_programs(1)

    @pl.when(l == 0)
    def _init():
        acc_ref[...] = jnp.zeros_like(acc_ref)
        den_ref[...] = jnp.zeros_like(den_ref)

    x = x_ref[...]                              # (tile_l, D), f32 or bf16
    m = mask_ref[...]                           # (Q, tile_l)

    if mask_tail:
        # Ragged last tile: rows past seq_len hold undefined data from the
        # overhanging DMA -> zero both the mask columns and the x rows.
        col = l * tile_l + lax.broadcasted_iota(jnp.int32, m.shape, 1)
        mbin = ((m > 0) & (col < seq_len)).astype(x.dtype)          # (Q, tile_l)
        row = l * tile_l + lax.broadcasted_iota(jnp.int32, (x.shape[0], 1), 0)
        x = jnp.where(row < seq_len, x, 0.0)
    else:
        # Aligned case (common): no iota / compare / select filler per step.
        mbin = (m > 0).astype(x.dtype)                               # (Q, tile_l)

    # MXU-natural contraction: (Q, tl) @ (tl, D) -> (Q, D), f32 accumulate.
    acc_ref[...] += jnp.dot(mbin, x, preferred_element_type=jnp.float32)
    # Per-agent counts (f32 so bf16 mbin never saturates the integer count).
    den_ref[...] += jnp.sum(mbin.astype(jnp.float32), axis=-1, keepdims=True)

    @pl.when(l == n_l - 1)
    def _finalize():
        # Normalize by the mask counts; approx reciprocal runs on the EUP and
        # its per-row scale error cancels through LayerNorm.
        inv = pl.reciprocal(den_ref[...] + denorm_eps, approx=True)   # (Q, 1)
        pooled = acc_ref[...] * inv                                   # (Q, D)

        # LayerNorm over the feature axis (PyTorch default eps = 1e-5).
        mu = jnp.mean(pooled, axis=-1, keepdims=True)
        cen = pooled - mu
        var = jnp.mean(cen * cen, axis=-1, keepdims=True)
        y = cen * lax.rsqrt(var + ln_eps) * gamma_ref[...] + beta_ref[...]

        # Linear(embed_dims, embed_dims): weight already (in, out).
        out = jnp.dot(y, w_ref[...], preferred_element_type=jnp.float32)
        out_ref[...] = (out + b_ref[...]).astype(out_ref.dtype)


def _pick_tile_l(L: int, target: int = 1024) -> int:
    """Largest multiple of 128 dividing L that is <= target (keeps the mask
    block lane-aligned and the aligned fast path on).  Falls back to full L
    when L is small, else to `target` (ragged tail handled in-kernel)."""
    best = 0
    t = 128
    while t <= min(L, target):
        if L % t == 0:
            best = t
        t += 128
    if best:
        return best
    return L if L <= target else target


def agent_mask_pooling(x, mask, ln_gamma, ln_beta, w_in_out, bias, *, tile_l=None):
    """x: (B, L, D); mask: (B, L, Q); w_in_out: (D, D) pre-transposed Linear weight.

    On v7x, pass a larger tile_l (e.g. 2048-8192) to move >=1 MiB per grid step;
    raise pltpu.CompilerParams(vmem_limit_bytes=...) if you exceed the scoped
    default.  The auto-picked default (<=1024) fits every generation's default.
    """
    B, L, D = x.shape
    Q = mask.shape[-1]
    tl = _pick_tile_l(L) if tile_l is None else min(tile_l, L)
    n_l = pl.cdiv(L, tl)
    mask_tail = (L % tl) != 0

    # One-time layout change: present the mask L-last so the kernel's mask tile
    # is lane-dense and the pooling matmul needs no implicit LHS transpose.
    mask_t = jnp.swapaxes(mask, 1, 2)          # (B, Q, L)

    kernel = partial(
        _agent_mask_pool_kernel,
        seq_len=L, tile_l=tl, mask_tail=mask_tail,
        denorm_eps=1e-8, ln_eps=1e-5,
    )

    return pl.pallas_call(
        kernel,
        out_shape=jax.ShapeDtypeStruct((B, Q, D), x.dtype),
        grid=(B, n_l),
        in_specs=[
            pl.BlockSpec((None, tl, D), lambda b, l: (b, l, 0)),   # x tile
            pl.BlockSpec((None, Q, tl), lambda b, l: (b, 0, l)),   # mask tile (L-last)
            pl.BlockSpec((1, D), lambda b, l: (0, 0)),             # LN gamma (resident)
            pl.BlockSpec((1, D), lambda b, l: (0, 0)),             # LN beta  (resident)
            pl.BlockSpec((D, D), lambda b, l: (0, 0)),             # Linear W (resident)
            pl.BlockSpec((1, D), lambda b, l: (0, 0)),             # Linear b (resident)
        ],
        out_specs=pl.BlockSpec((None, Q, D), lambda b, l: (b, 0, 0)),
        scratch_shapes=[
            pltpu.VMEM((Q, D), jnp.float32),   # pooled accumulator
            pltpu.VMEM((Q, 1), jnp.float32),   # per-agent denominators
        ],
        compiler_params=pltpu.CompilerParams(
            dimension_semantics=("parallel", "arbitrary"),
        ),
    )(
        x,
        mask_t,
        ln_gamma.reshape(1, D),
        ln_beta.reshape(1, D),
        w_in_out,
        bias.reshape(1, D),
    )


def _reference(x, mask, gamma, beta, w, bias):
    """Pure-JAX reference of the PyTorch module's forward pass."""
    mbin = (mask > 0).astype(x.dtype)
    denorm = mbin.sum(axis=1, keepdims=True) + 1e-8                  # (B, 1, Q)
    pooled = jnp.einsum("bld,blq->bqd", x, mbin / denorm)            # (B, Q, D)
    mu = pooled.mean(-1, keepdims=True)
    var = ((pooled - mu) ** 2).mean(-1, keepdims=True)
    normed = (pooled - mu) / jnp.sqrt(var + 1e-5)
    y = normed * gamma + beta
    return y @ w.T + bias


if __name__ == "__main__":
    key = jax.random.PRNGKey(0)
    kx, km, kg, kb, kw, kbias = jax.random.split(key, 6)

    # Shapes consistent with the module: B batches, L = hw tokens,
    # Q = agent_length, D = embed_dims (128 keeps the output lane-dense).
    B, L, Q, D = 2, 2048, 8, 128

    x = jax.random.normal(kx, (B, L, D), jnp.float32)
    mask = jax.random.normal(km, (B, L, Q), jnp.float32)   # raw scores; >0 -> selected

    # Parameters (random so the numerical check is meaningful).
    gamma = 1.0 + 0.1 * jax.random.normal(kg, (D,), jnp.float32)     # LayerNorm weight
    beta = 0.1 * jax.random.normal(kb, (D,), jnp.float32)            # LayerNorm bias
    bound = 1.0 / jnp.sqrt(jnp.float32(D))
    w = jax.random.uniform(kw, (D, D), jnp.float32, -bound, bound)   # PyTorch (out, in)
    bias = jax.random.uniform(kbias, (D,), jnp.float32, -bound, bound)

    # Pre-transpose the Linear weight ONCE (weight-stationary).
    w_t = jnp.transpose(w)                                           # (in, out)

    # --- main case: aligned L, auto tile (1024) -----------------------------
    out = agent_mask_pooling(x, mask, gamma, beta, w_t, bias)
    out = jax.block_until_ready(out)
    ref = _reference(x, mask, gamma, beta, w, bias)
    assert out.shape == (B, Q, D)
    err = float(jnp.max(jnp.abs(out - ref)))
    assert jnp.allclose(out, ref, atol=2e-4, rtol=2e-4), err

    # --- ragged case: L not a multiple of the tile (exercises tail masking) --
    L2 = 384
    x2 = x[:, :L2]
    mask2 = mask[:, :L2]
    out2 = agent_mask_pooling(x2, mask2, gamma, beta, w_t, bias, tile_l=256)
    out2 = jax.block_until_ready(out2)
    ref2 = _reference(x2, mask2, gamma, beta, w, bias)
    err2 = float(jnp.max(jnp.abs(out2 - ref2)))
    assert jnp.allclose(out2, ref2, atol=2e-4, rtol=2e-4), err2

    print("KERNEL_OK")
</pallas_src>

<mosaic_0001>
module attributes {stable_mosaic.version = 11 : i64} {
  func.func @_agent_mask_pool_kernel(%arg0: i32, %arg1: i32, %arg2: memref<1x1024x128xf32, #tpu.memory_space<vmem>>, %arg3: memref<1x8x1024xf32, #tpu.memory_space<vmem>>, %arg4: memref<1x128xf32, #tpu.memory_space<vmem>>, %arg5: memref<1x128xf32, #tpu.memory_space<vmem>>, %arg6: memref<128x128xf32, #tpu.memory_space<vmem>>, %arg7: memref<1x128xf32, #tpu.memory_space<vmem>>, %arg8: memref<1x8x128xf32, #tpu.memory_space<vmem>>, %arg9: memref<8x128xf32, #tpu.memory_space<vmem>>, %arg10: memref<8x1xf32, #tpu.memory_space<vmem>>) attributes {dimension_semantics = [#tpu.dimension_semantics<parallel>, #tpu.dimension_semantics<arbitrary>], iteration_bounds = array<i64: 2, 2>, scalar_prefetch = 0 : i64, scratch_operands = 2 : i64, tpu.core_type = #tpu.core_type<tc>, window_params = [{transform_indices = @transform_0, window_bounds = array<i64: 1, 1024, 128>}, {transform_indices = @transform_1, window_bounds = array<i64: 1, 8, 1024>}, {pipeline_mode = #tpu.pipeline_mode<synchronous>, transform_indices = @transform_2, window_bounds = array<i64: 1, 128>}, {pipeline_mode = #tpu.pipeline_mode<synchronous>, transform_indices = @transform_3, window_bounds = array<i64: 1, 128>}, {pipeline_mode = #tpu.pipeline_mode<synchronous>, transform_indices = @transform_4, window_bounds = array<i64: 128, 128>}, {pipeline_mode = #tpu.pipeline_mode<synchronous>, transform_indices = @transform_5, window_bounds = array<i64: 1, 128>}, {transform_indices = @transform_6, window_bounds = array<i64: 1, 8, 128>}]} {
    %c0_i32 = arith.constant 0 : i32
    %0 = arith.cmpi eq, %arg1, %c0_i32 : i32
    %1 = arith.extui %0 : i1 to i32
    %c0_i32_0 = arith.constant 0 : i32
    %2 = arith.cmpi ne, %1, %c0_i32_0 : i32
    scf.if %2 {
      %cst_17 = arith.constant 0.000000e+00 : f32
      %23 = vector.broadcast %cst_17 : f32 to vector<8x128xf32>
      %c0_18 = arith.constant 0 : index
      %c0_19 = arith.constant 0 : index
      %24 = vector.load %arg9[%c0_18, %c0_19] : memref<8x128xf32, #tpu.memory_space<vmem>>, vector<8x128xf32>
      tpu.vector_store %arg9[%c0_18, %c0_19], %23 {strides = array<i32>} : memref<8x128xf32, #tpu.memory_space<vmem>>, vector<8x128xf32>,
      %cst_20 = arith.constant 0.000000e+00 : f32
      %25 = vector.broadcast %cst_20 : f32 to vector<8x1xf32>
      %c0_21 = arith.constant 0 : index
      %c0_22 = arith.constant 0 : index
      %26 = vector.load %arg10[%c0_21, %c0_22] : memref<8x1xf32, #tpu.memory_space<vmem>>, vector<8x1xf32>
      tpu.vector_store %arg10[%c0_21, %c0_22], %25 {strides = array<i32>} : memref<8x1xf32, #tpu.memory_space<vmem>>, vector<8x1xf32>,
    } else {
    }
    %c0 = arith.constant 0 : index
    %c0_1 = arith.constant 0 : index
    %c0_2 = arith.constant 0 : index
    %3 = vector.load %arg2[%c0, %c0_1, %c0_2] : memref<1x1024x128xf32, #tpu.memory_space<vmem>>, vector<1x1024x128xf32>
    %4 = vector.shape_cast %3 : vector<1x1024x128xf32> to vector<1024x128xf32>
    %c0_3 = arith.constant 0 : index
    %c0_4 = arith.constant 0 : index
    %c0_5 = arith.constant 0 : index
    %5 = vector.load %arg3[%c0_3, %c0_4, %c0_5] : memref<1x8x1024xf32, #tpu.memory_space<vmem>>, vector<1x8x1024xf32>
    %6 = vector.shape_cast %5 : vector<1x8x1024xf32> to vector<8x1024xf32>
    %cst = arith.constant 0.000000e+00 : f32
    %7 = vector.broadcast %cst : f32 to vector<8x1024xf32>
    %8 = arith.cmpf ogt, %6, %7 : vector<8x1024xf32>
    %9 = arith.extui %8 : vector<8x1024xi1> to vector<8x1024xi32>
    %10 = arith.sitofp %9 : vector<8x1024xi32> to vector<8x1024xf32>
    %c0_6 = arith.constant 0 : index
    %c0_7 = arith.constant 0 : index
    %11 = vector.load %arg9[%c0_6, %c0_7] : memref<8x128xf32, #tpu.memory_space<vmem>>, vector<8x128xf32>
    %cst_8 = arith.constant dense<0.000000e+00> : vector<8x128xf32>
    %12 = tpu.matmul %10, %4, %cst_8 {dimension_numbers = #tpu.dot_dimension_numbers<[1], [0], [0], [1], [0, 0, 1, 1], [], []>} : vector<8x1024xf32>, vector<1024x128xf32>, vector<8x128xf32> -> vector<8x128xf32>
    %13 = arith.addf %11, %12 : vector<8x128xf32>
    %c0_9 = arith.constant 0 : index
    %c0_10 = arith.constant 0 : index
    %14 = vector.load %arg9[%c0_9, %c0_10] : memref<8x128xf32, #tpu.memory_space<vmem>>, vector<8x128xf32>
    tpu.vector_store %arg9[%c0_9, %c0_10], %13 {strides = array<i32>} : memref<8x128xf32, #tpu.memory_space<vmem>>, vector<8x128xf32>,
    %c0_11 = arith.constant 0 : index
    %c0_12 = arith.constant 0 : index
    %15 = vector.load %arg10[%c0_11, %c0_12] : memref<8x1xf32, #tpu.memory_space<vmem>>, vector<8x1xf32>
    %cst_13 = arith.constant dense<0.000000e+00> : vector<8xf32>
    %16 = vector.multi_reduction <add>, %10, %cst_13 [1] : vector<8x1024xf32> to vector<8xf32>
    %17 = vector.shape_cast %16 : vector<8xf32> to vector<8x1xf32>
    %18 = arith.addf %15, %17 : vector<8x1xf32>
    %c0_14 = arith.constant 0 : index
    %c0_15 = arith.constant 0 : index
    %19 = vector.load %arg10[%c0_14, %c0_15] : memref<8x1xf32, #tpu.memory_space<vmem>>, vector<8x1xf32>
    tpu.vector_store %arg10[%c0_14, %c0_15], %18 {strides = array<i32>} : memref<8x1xf32, #tpu.memory_space<vmem>>, vector<8x1xf32>,
    %c1_i32 = arith.constant 1 : i32
    %20 = arith.cmpi eq, %arg1, %c1_i32 : i32
    %21 = arith.extui %20 : i1 to i32
    %c0_i32_16 = arith.constant 0 : i32
    %22 = arith.cmpi ne, %21, %c0_i32_16 : i32
    scf.if %22 {
      %c0_17 = arith.constant 0 : index
      %c0_18 = arith.constant 0 : index
      %23 = vector.load %arg10[%c0_17, %c0_18] : memref<8x1xf32, #tpu.memory_space<vmem>>, vector<8x1xf32>
      %cst_19 = arith.constant 9.99999993E-9 : f32
      %24 = vector.broadcast %cst_19 : f32 to vector<8x1xf32>
      %25 = arith.addf %23, %24 : vector<8x1xf32>
      %26 = tpu.reciprocal %25 {approx = true} : vector<8x1xf32> -> vector<8x1xf32>
      %c0_20 = arith.constant 0 : index
      %c0_21 = arith.constant 0 : index
      %27 = vector.load %arg9[%c0_20, %c0_21] : memref<8x128xf32, #tpu.memory_space<vmem>>, vector<8x128xf32>
      %28 = vector.broadcast %26 : vector<8x1xf32> to vector<8x128xf32>
      %29 = arith.mulf %27, %28 : vector<8x128xf32>
      %cst_22 = arith.constant dense<0.000000e+00> : vector<8xf32>
      %30 = vector.multi_reduction <add>, %29, %cst_22 [1] : vector<8x128xf32> to vector<8xf32>
      %31 = vector.shape_cast %30 : vector<8xf32> to vector<8x1xf32>
      %cst_23 = arith.constant 1.280000e+02 : f32
      %32 = vector.broadcast %cst_23 : f32 to vector<8x1xf32>
      %33 = arith.divf %31, %32 : vector<8x1xf32>
      %34 = vector.broadcast %33 : vector<8x1xf32> to vector<8x128xf32>
      %35 = arith.subf %29, %34 : vector<8x128xf32>
      %36 = arith.mulf %35, %35 : vector<8x128xf32>
      %cst_24 = arith.constant dense<0.000000e+00> : vector<8xf32>
      %37 = vector.multi_reduction <add>, %36, %cst_24 [1] : vector<8x128xf32> to vector<8xf32>
      %38 = vector.shape_cast %37 : vector<8xf32> to vector<8x1xf32>
      %cst_25 = arith.constant 1.280000e+02 : f32
      %39 = vector.broadcast %cst_25 : f32 to vector<8x1xf32>
      %40 = arith.divf %38, %39 : vector<8x1xf32>
      %cst_26 = arith.constant 9.99999974E-6 : f32
      %41 = vector.broadcast %cst_26 : f32 to vector<8x1xf32>
      %42 = arith.addf %40, %41 : vector<8x1xf32>
      %43 = math.rsqrt %42 : vector<8x1xf32>
      %44 = vector.broadcast %43 : vector<8x1xf32> to vector<8x128xf32>
      %45 = arith.mulf %35, %44 : vector<8x128xf32>
      %c0_27 = arith.constant 0 : index
      %c0_28 = arith.constant 0 : index
      %46 = vector.load %arg4[%c0_27, %c0_28] : memref<1x128xf32, #tpu.memory_space<vmem>>, vector<1x128xf32>
      %47 = vector.broadcast %46 : vector<1x128xf32> to vector<8x128xf32>
      %48 = arith.mulf %45, %47 : vector<8x128xf32>
      %c0_29 = arith.constant 0 : index
      %c0_30 = arith.constant 0 : index
      %49 = vector.load %arg5[%c0_29, %c0_30] : memref<1x128xf32, #tpu.memory_space<vmem>>, vector<1x128xf32>
      %50 = vector.broadcast %49 : vector<1x128xf32> to vector<8x128xf32>
      %51 = arith.addf %48, %50 : vector<8x128xf32>
      %c0_31 = arith.constant 0 : index
      %c0_32 = arith.constant 0 : index
      %52 = vector.load %arg6[%c0_31, %c0_32] : memref<128x128xf32, #tpu.memory_space<vmem>>, vector<128x128xf32>
      %cst_33 = arith.constant dense<0.000000e+00> : vector<8x128xf32>
      %53 = tpu.matmul %51, %52, %cst_33 {dimension_numbers = #tpu.dot_dimension_numbers<[1], [0], [0], [1], [0, 0, 1, 1], [], []>} : vector<8x128xf32>, vector<128x128xf32>, vector<8x128xf32> -> vector<8x128xf32>
      %c0_34 = arith.constant 0 : index
      %c0_35 = arith.constant 0 : index
      %54 = vector.load %arg7[%c0_34, %c0_35] : memref<1x128xf32, #tpu.memory_space<vmem>>, vector<1x128xf32>
      %55 = vector.broadcast %54 : vector<1x128xf32> to vector<8x128xf32>
      %56 = arith.addf %53, %55 : vector<8x128xf32>
      %c0_36 = arith.constant 0 : index
      %c0_37 = arith.constant 0 : index
      %c0_38 = arith.constant 0 : index
      %57 = vector.load %arg8[%c0_36, %c0_37, %c0_38] : memref<1x8x128xf32, #tpu.memory_space<vmem>>, vector<1x8x128xf32>
      %58 = vector.shape_cast %57 : vector<1x8x128xf32> to vector<8x128xf32>
      %59 = vector.shape_cast %56 : vector<8x128xf32> to vector<1x8x128xf32>
      tpu.vector_store %arg8[%c0_36, %c0_37, %c0_38], %59 {strides = array<i32>} : memref<1x8x128xf32, #tpu.memory_space<vmem>>, vector<1x8x128xf32>,
    } else {
    }
    return
  }
  func.func @transform_0(%arg0: i32, %arg1: i32) -> (i32, i32, i32) {
    %c0_i32 = arith.constant 0 : i32
    %c0_i32_0 = arith.constant 0 : i32
    return %arg0, %arg1, %c0_i32 : i32, i32, i32
  }
  func.func @transform_1(%arg0: i32, %arg1: i32) -> (i32, i32, i32) {
    %c0_i32 = arith.constant 0 : i32
    %c0_i32_0 = arith.constant 0 : i32
    return %arg0, %c0_i32, %arg1 : i32, i32, i32
  }
  func.func @transform_2(%arg0: i32, %arg1: i32) -> (i32, i32) {
    %c0_i32 = arith.constant 0 : i32
    %c0_i32_0 = arith.constant 0 : i32
    %c0_i32_1 = arith.constant 0 : i32
    return %c0_i32, %c0_i32_0 : i32, i32
  }
  func.func @transform_3(%arg0: i32, %arg1: i32) -> (i32, i32) {
    %c0_i32 = arith.constant 0 : i32
    %c0_i32_0 = arith.constant 0 : i32
    %c0_i32_1 = arith.constant 0 : i32
    return %c0_i32, %c0_i32_0 : i32, i32
  }
  func.func @transform_4(%arg0: i32, %arg1: i32) -> (i32, i32) {
    %c0_i32 = arith.constant 0 : i32
    %c0_i32_0 = arith.constant 0 : i32
    %c0_i32_1 = arith.constant 0 : i32
    return %c0_i32, %c0_i32_0 : i32, i32
  }
  func.func @transform_5(%arg0: i32, %arg1: i32) -> (i32, i32) {
    %c0_i32 = arith.constant 0 : i32
    %c0_i32_0 = arith.constant 0 : i32
    %c0_i32_1 = arith.constant 0 : i32
    return %c0_i32, %c0_i32_0 : i32, i32
  }
  func.func @transform_6(%arg0: i32, %arg1: i32) -> (i32, i32, i32) {
    %c0_i32 = arith.constant 0 : i32
    %c0_i32_0 = arith.constant 0 : i32
    %c0_i32_1 = arith.constant 0 : i32
    return %arg0, %c0_i32, %c0_i32_0 : i32, i32, i32
  }
}

</mosaic_0001>

<bundles_post_ra>
// kernel: tpu_custom_call.1
= control target key start
LH: loop header
LB: loop body
LE: loop exit
PB: predicated region body
PF: predicated region fallthrough
CT: control target
= control target key end

     0   :  { %s2642_s0 = inlined_call_operand.hbm [shape: f32[2,2048,128], index: 0, kind: input, shape index: {}]   ;;  %s2643_s1 = inlined_call_operand.hbm [shape: f32[2,8,2048], index: 1, kind: input, shape index: {}]   ;;  %s2644_s2 = inlined_call_operand.hbm [shape: f32[1,128], index: 2, kind: input, shape index: {}]   ;;  %s2645_s3 = inlined_call_operand.hbm [shape: f32[1,128], index: 3, kind: input, shape index: {}]   ;;  %s2646_s4 = inlined_call_operand.hbm [shape: f32[128,128], index: 4, kind: input, shape index: {}]   ;;  %s2647_s5 = inlined_call_operand.hbm [shape: f32[1,128], index: 5, kind: input, shape index: {}]   ;;  %s2648_s6 = inlined_call_operand.hbm [shape: f32[2,8,128], index: 6, kind: output, shape index: {}]  }
   0x1   :  { %2663 = sst [smem:[#allocation31_spill]] %s2642_s0 }
   0x2   :  { %2664 = sst [smem:[#allocation32_spill]] %s2644_s2 }
   0x3   :  { %2665 = sst [smem:[#allocation33_spill]] %s2645_s3 }
   0x4   :  { %2666 = sst [smem:[#allocation34_spill]] %s2646_s4 }
   0x5   :  { %2667 = sst [smem:[#allocation35_spill]] %s2647_s5 }
   0x6   :  { %2668 = sst [smem:[#allocation36_spill]] %s2648_s6 }
   0x7   :  { %11 = vsyncpa [#allocation5], 0 }
   0x8   :  { %13 = vsyncpa [#allocation5 + $0x1], 0 }
   0x9   :  { %14 = vsyncpa [#allocation8], 0 }
   0xa   :  { %16 = vsyncpa [#allocation8 + $0x1], 0 }
   0xb   :  { %17 = vsyncpa [#allocation11], 0 }
   0xc   :  { %18 = vsyncpa [#allocation14], 0 }
   0xd   :  { %19 = vsyncpa [#allocation6], 0 }
   0xe   :  { %21 = vsyncpa [#allocation6 + $0x1], 0  ;;  %s2061_s21 = smov 0   ;;  %s2063_s22 = smov 0  }
   0xf   :  { %s2065_s23 = smov 0   ;;  %s2067_s24 = smov 0  }
  0x10   :  { %s2069_s25 = smov 0   ;;  %s2071_s26 = smov 0  }
  0x11   :  { %s2073_s27 = smov 0   ;;  %s2075_s28 = smov 0  }
  0x12   :  { %s2077_s29 = smov 0   ;;  %s2079_s30 = smov 0  }
  0x13   :  { %s2081_s7 = smov 0  }
  0x14 LB: > { %2669 = sst [smem:[#allocation22_spill]] %s1968_s21  ;;  %s2115_s8 = sadd.s32 4294967295, %s2008_s7   ;;  %s2008_s7 = sphi %s2081_s7, %s27_s7   ;;  %s2004_s30 = sphi %s2079_s30, %s2724_s30   ;;  %s2000_s29 = sphi %s2077_s29, %s2723_s29   ;;  %s1996_s28 = sphi %s2075_s28, %s2722_s28   ;;  %s1992_s27 = sphi %s2073_s27, %s2721_s27   ;;  %s1988_s26 = sphi %s2071_s26, %s2713_s26   ;;  %s1984_s25 = sphi %s2069_s25, %s2720_s25   ;;  %s1980_s24 = sphi %s2067_s24, %s2719_s24   ;;  %s1976_s23 = sphi %s2065_s23, %s2718_s23   ;;  %s1972_s22 = sphi %s2063_s22, %s2717_s22   ;;  %s1968_s21 = sphi %s2061_s21, %s2716_s21  }
  0x15   : > { %2670 = sst [smem:[#allocation23_spill]] %s1988_s26  ;;  %s1144_s9 = sadd.s32 4294967294, %s2008_s7  }
  0x16   : > { %2671 = sst [smem:[#allocation24_spill]] %s1992_s27  ;;  %p61_p0 = scmp.ne.s32.totalorder %s1984_s25, %s1980_s24 }
  0x17   : > { %2672 = sst [smem:[#allocation25_spill]] %s1996_s28  ;;  %p2652_p1 = scmp.eq.s32.totalorder %s2115_s8, 0 }
  0x18   : > { %p196_p2 = scmp.ne.s32.totalorder %s1976_s23, %s1972_s22  ;;  %p197_p4 = scmp.eq.s32.totalorder %s2115_s8, 3 }
  0x19   : > { %p2125_p3 = por %p2652_p1, %p61_p0  ;;  %p202_p5 = scmp.ne.s32.totalorder %s1972_s22, %s1968_s21 }
  0x1a   : > { %p203_p6 = scmp.eq.s32.totalorder %s1144_s9, 3  ;;  %p2132_p7 = por %p197_p4, %p196_p2 }
  0x1b   : > { %s2673_s11 = scalar_select %p2125_p3, 1, 0 }
  0x1c   : > { %s2674_s12 = scalar_select %p2132_p7, 1, 0 }
  0x1d   : > { %p1145_p8 = scmp.ge.s32.totalorder %s2008_s7, 1  ;;  %p2137_p9 = por %p203_p6, %p202_p5 }
  0x1e   : > { %2675 = sst [smem:[#allocation26_spill]] %s2674_s12  ;;  %p210_p10 = scmp.lt.s32.totalorder %s2008_s7, 5 }
  0x1f   : > { %s2676_s13 = scalar_select %p2137_p9, 1, 0 }
  0x20   : > { %p2142_p11 = pnand %p1145_p8, %p210_p10  ;;  %s2010_s15 = smov [#allocation9]  }
  0x21   : > { %2677 = sst [smem:[#allocation27_spill]] %s2676_s13  ;;  %s223_s16 = sshll.u32 %s2010_s15, 4  ;;  %s224_s16 = int_to_ptr.vmem [resolvable:$true] %s223_s16 }
  0x22   : > { %s2678_s14 = scalar_select %p2142_p11, 1, 0 }
  0x23   : > { %p1558_p12 = pneg %p2142_p11  ;;  %s2011_s17 = smov [#allocation10]  }
  0x24   : > { %s234_s18 = sshll.u32 %s2011_s17, 4  ;;  %s2012_s20 = smov [#allocation12]   ;;  %s2154_s18 = int_to_ptr.vmem [resolvable:$true] %s234_s18 }
  0x25   : > { %p2150_p13 = pnand %p1558_p12, %p2652_p1  ;;  %s244_s24 = sshll.u32 %s2012_s20, 4  ;;  %s2156_s24 = int_to_ptr.vmem [resolvable:$true] %s244_s24 }
  0x26   : > { %s2680_s2 = sld [smem:[#allocation32_spill]] }
  0x27   : > { %p2166_p2 = pneg %p2150_p13 }
  0x2c   : > { %s1698_s15 = scalar_lea.hbm %s2680_s2, 16 }
  0x2d   : > { %p1699_p0 = scmp.ne.s32.totalorder %s2680_s2, %s1698_s15  ;;  %p1705_p6 = scmp.lt.u32.totalorder %s1698_s15, %s2680_s2 }
  0x2f   : > { %p1701_p4 = pnand %p2166_p2, %p1699_p0 }
  0x31   : > { %p1702_p5 = pneg %p1701_p4 }
  0x33   : > { %p1707_p8 = pnand %p1705_p6, %p1702_p5 }
  0x35   : > { %1710 = shalt.err (!%p1707_p8)
}
  0x36   : > { %s1711_s10 = scalar_lea.vmem %s224_s16, 16  ;;  %s1718_s21 = scalar_lea.vmem %s224_s16, 32 }
  0x37   : > { %p1712_p10 = scmp.ne.s32.totalorder %s224_s16, %s1711_s10  ;;  %p1719_p9 = scmp.lt.s32.totalorder %s224_s16, %s224_s16 }
  0x38   : > { %p1720_p7 = scmp.lt.s32.totalorder %s1718_s21, %s1711_s10 }
  0x39   : > { %p1714_p12 = pnand %p1712_p10, %p2166_p2 }
  0x3a   : > { %p1721_p3 = por %p1720_p7, %p1719_p9 }
  0x3b   : > { %p1715_p1 = pneg %p1714_p12 }
  0x3d   : > { %p1722_p11 = pnand %p1721_p3, %p1715_p1 }
  0x3f   : > { %1725 = shalt.err (!%p1722_p11)
}
  0x40   : > { %1561 = dma.hbm_to_vmem [thread:$0]  (!%p2150_p13), %s2680_s2, 16, %s224_s16, [#allocation8]  }
  0x41   : > { %s2682_s3 = sld [smem:[#allocation33_spill]] }
  0x47   : > { %s1726_s20 = scalar_lea.hbm %s2682_s3, 16 }
  0x48   : > { %p1727_p0 = scmp.ne.s32.totalorder %s2682_s3, %s1726_s20  ;;  %p1733_p1 = scmp.lt.u32.totalorder %s1726_s20, %s2682_s3 }
  0x4a   : > { %p1729_p4 = pnand %p1727_p0, %p2166_p2 }
  0x4c   : > { %p1730_p7 = pneg %p1729_p4 }
  0x4e   : > { %p1735_p3 = pnand %p1733_p1, %p1730_p7 }
  0x50   : > { %1738 = shalt.err (!%p1735_p3)
}
  0x51   : > { %s1739_s16 = scalar_lea.vmem %s2154_s18, 16  ;;  %s1746_s28 = scalar_lea.vmem %s2154_s18, 32 }
  0x52   : > { %p1740_p9 = scmp.ne.s32.totalorder %s2154_s18, %s1739_s16  ;;  %p1747_p6 = scmp.lt.s32.totalorder %s2154_s18, %s2154_s18 }
  0x53   : > { %p1748_p8 = scmp.lt.s32.totalorder %s1746_s28, %s1739_s16 }
  0x54   : > { %p1742_p11 = pnand %p1740_p9, %p2166_p2 }
  0x55   : > { %p1749_p10 = por %p1748_p8, %p1747_p6 }
  0x56   : > { %p1743_p5 = pneg %p1742_p11 }
  0x58   : > { %p1750_p12 = pnand %p1749_p10, %p1743_p5 }
  0x5a   : > { %1753 = shalt.err (!%p1750_p12)
}
  0x5b   : > { %1564 = dma.hbm_to_vmem [thread:$0]  (!%p2150_p13), %s2682_s3, 16, %s2154_s18, [#allocation11]  }
  0x5c   : > { %s2683_s4 = sld [smem:[#allocation34_spill]] }
  0x62   : > { %s1754_s15 = scalar_lea.hbm %s2683_s4, 2048 }
  0x63   : > { %p1755_p0 = scmp.ne.s32.totalorder %s2683_s4, %s1754_s15  ;;  %p1761_p1 = scmp.lt.u32.totalorder %s1754_s15, %s2683_s4 }
  0x65   : > { %p1757_p4 = pnand %p1755_p0, %p2166_p2 }
  0x67   : > { %p1758_p7 = pneg %p1757_p4 }
  0x69   : > { %p1763_p3 = pnand %p1761_p1, %p1758_p7 }
  0x6b   : > { %1766 = shalt.err (!%p1763_p3)
}
  0x6c   : > { %s1767_s18 = scalar_lea.vmem %s2156_s24, 2048  ;;  %p1775_p6 = scmp.lt.s32.totalorder %s2156_s24, %s2156_s24 }
  0x6d   : > { %p1768_p9 = scmp.ne.s32.totalorder %s2156_s24, %s1767_s18  ;;  %p1776_p8 = scmp.lt.s32.totalorder %s1767_s18, %s1767_s18 }
  0x6f   : > { %p1770_p11 = pnand %p1768_p9, %p2166_p2  ;;  %p1777_p10 = por %p1776_p8, %p1775_p6 }
  0x71   : > { %p1771_p5 = pneg %p1770_p11 }
  0x73   : > { %p1778_p12 = pnand %p1777_p10, %p1771_p5 }
  0x75   : > { %1781 = shalt.err (!%p1778_p12)
}
  0x76   : > { %s2658_s28 = smov 128   ;;  %s2659_s12 = smov 8  }
  0x77   : > { %1567 = dma.hbm_to_vmem [thread:$0]  (!%p2150_p13), %s2683_s4, 2048, %s2156_s24, [#allocation11], %s2658_s28, %s2658_s28, %s2659_s12  }
  0x78   : > { %s2015_s6 = smov [#allocation13]   ;;  %s2684_s5 = sld [smem:[#allocation35_spill]] }
  0x79   : > { %s258_s15 = sshll.u32 %s2015_s6, 4  ;;  %s259_s15 = int_to_ptr.vmem [resolvable:$true] %s258_s15 }
  0x7e   : > { %s1782_s21 = scalar_lea.hbm %s2684_s5, 16 }
  0x7f   : > { %p1783_p0 = scmp.ne.s32.totalorder %s2684_s5, %s1782_s21  ;;  %p1789_p1 = scmp.lt.u32.totalorder %s1782_s21, %s2684_s5 }
  0x81   : > { %p1785_p4 = pnand %p1783_p0, %p2166_p2 }
  0x83   : > { %p1786_p7 = pneg %p1785_p4 }
  0x85   : > { %p1791_p3 = pnand %p1789_p1, %p1786_p7 }
  0x87   : > { %1794 = shalt.err (!%p1791_p3)
}
  0x88   : > { %s1795_s24 = scalar_lea.vmem %s259_s15, 16  ;;  %s1802_s13 = scalar_lea.vmem %s259_s15, 32 }
  0x89   : > { %p1796_p9 = scmp.ne.s32.totalorder %s259_s15, %s1795_s24  ;;  %p1803_p6 = scmp.lt.s32.totalorder %s259_s15, %s259_s15 }
  0x8a   : > { %p1804_p8 = scmp.lt.s32.totalorder %s1802_s13, %s1795_s24 }
  0x8b   : > { %p1798_p11 = pnand %p1796_p9, %p2166_p2 }
  0x8c   : > { %p1805_p10 = por %p1804_p8, %p1803_p6 }
  0x8d   : > { %p1799_p5 = pneg %p1798_p11 }
  0x8f   : > { %p1806_p12 = pnand %p1805_p10, %p1799_p5 }
  0x91   : > { %1809 = shalt.err (!%p1806_p12)
}
  0x92   : > { %1570 = dma.hbm_to_vmem [thread:$0]  (!%p2150_p13), %s2684_s5, 16, %s259_s15, [#allocation14]  }
  0x93   : > { %s36_s2 = sadd.s32 1, %s2000_s29  ;;  %s39_s3 = sadd.s32 1, %s2004_s30 }
  0x94   : > { %p37_p2 = scmp.ge.s32.totalorder %s36_s2, 2  ;;  %s48_s19 = sadd.s32 1, %s1988_s26 }
  0x95   : > { %p55_p0 = scmp.ne.s32.totalorder %s1988_s26, %s1984_s25  ;;  %p56_p4 = scmp.eq.s32.totalorder %s2008_s7, 0 }
  0x96   : > { %s2726_s2 = smov (%p37_p2, %s36_s2), 0  ;;  %s2728_s3 = smov (!%p37_p2, %s39_s3), %s2004_s30 }
  0x97   : > { %2685 = sst [smem:[#allocation28_spill]] %s2726_s2  ;;  %s44_s17 = ssub.s32 %s2000_s29, %s2726_s2 }
  0x98   : > { %p2261_p7 = por %p56_p4, %p55_p0  ;;  %p41_p13 = scmp.ge.s32.totalorder %s2728_s3, 2 }
  0x99   : > { %p1586_p1 = scmp.lt.s32.totalorder %s2008_s7, 4  ;;  %s2267_s15 = sand.u32 1, %s1988_s26  }
  0x9a   : > { %s1152_s10 = sshll.u32 %s2000_s29, 7  ;;  %s2730_s3 = smov (%p41_p13, %s2728_s3), 0 }
  0x9b   : > { %2687 = sst [smem:[#allocation29_spill]] %s2730_s3  ;;  %s1151_s21 = sshll.u32 %s2267_s15, 10 }
  0x9c   : > { %s43_s16 = ssub.s32 %s2004_s30, %s2730_s3  ;;  %s1153_s24 = sshll.u32 %s2004_s30, 8 }
  0x9d   : > { %s45_s18 = sor.u32 %s44_s17, %s43_s16  ;;  %p184_p3 = scmp.eq.s32.totalorder %s43_s16, 0 }
  0x9e   : > { %p46_p9 = scmp.eq.s32.totalorder %s45_s18, 0  ;;  %s2688_s13 = sadd.s32 1, %s1976_s23 }
  0x9f   : > { %s2279_s9 = scalar_select %p184_p3, %s1976_s23, %s2688_s13  }
  0xa0   : > { %s2282_s6 = scalar_select %p46_p9, %s1988_s26, %s48_s19  }
  0xa1   : > { %s279_s28 = sadd.s32 %s1153_s24, %s1152_s10  ;;  %s273_s12 = scalar_lea.vmem [#allocation4], %s1151_s21 }
  0xa2   : > { %2689 = sst [smem:[#allocation30_spill]] %s2282_s6  ;;  %s282_s4 = sshll.u32 %s273_s12, 4  ;;  %s2284_s4 = int_to_ptr.vmem [resolvable:$true] %s282_s4 }
  0xa3   : > { %s1154_s5 = sshll.u32 %s279_s28, 7  ;;  %s2690_s0 = sld [smem:[#allocation31_spill]] }
  0xa4   : > { %p2295_p11 = pnand %p1586_p1, %p2261_p7  ;;  %s1155_s12 = sshll.u32 %s2267_s15, 6 }
  0xa5   : > { %s270_s17 = scalar_lea.sflag [#allocation5], %s2267_s15 }
  0xa6   : > { %p1812_p6 = pneg %p2295_p11 }
  0xa9   : > { %s2289_s3 = scalar_lea.hbm %s2690_s0, %s1154_s5  ;;  %s1815_s2 = scalar_lea.hbm %s2690_s0, 65536 }
  0xaa   : > { %s1810_s10 = scalar_lea.hbm %s2289_s3, 16384  ;;  %p1816_p12 = scmp.lt.u32.totalorder %s2289_s3, %s2690_s0 }
  0xab   : > { %p1811_p5 = scmp.ne.s32.totalorder %s2289_s3, %s1810_s10  ;;  %p1817_p2 = scmp.lt.u32.totalorder %s1815_s2, %s1810_s10 }
  0xac   : > { %p1819_p4 = scmp.lt.u32.totalorder %s1810_s10, %s2289_s3 }
  0xad   : > { %p1813_p8 = pnand %p1812_p6, %p1811_p5  ;;  %p1818_p0 = por %p1817_p2, %p1816_p12 }
  0xaf   : > { %p1814_p10 = pneg %p1813_p8  ;;  %p1820_p7 = por %p1819_p4, %p1818_p0 }
  0xb1   : > { %p1821_p13 = pnand %p1820_p7, %p1814_p10 }
  0xb3   : > { %1824 = shalt.err (!%p1821_p13)
}
  0xb4   : > { %s1825_s16 = scalar_lea.vmem %s2284_s4, 16384  ;;  %s2016_s18 = smov [#allocation4]  }
  0xb5   : > { %p1826_p1 = scmp.ne.s32.totalorder %s2284_s4, %s1825_s16  ;;  %s1830_s24 = sshll.u32 %s2016_s18, 4  ;;  %s1831_s24 = int_to_ptr.vmem [resolvable:$false] %s1830_s24 }
  0xb6   : > { %s1832_s13 = scalar_lea.vmem %s1831_s24, 32768  ;;  %p1833_p5 = scmp.lt.s32.totalorder %s2284_s4, %s1831_s24 }
  0xb7   : > { %p1828_p3 = pnand %p1826_p1, %p1812_p6  ;;  %p1834_p8 = scmp.lt.s32.totalorder %s1832_s13, %s1825_s16 }
  0xb9   : > { %p1829_p9 = pneg %p1828_p3  ;;  %p1835_p12 = por %p1834_p8, %p1833_p5 }
  0xbb   : > { %p1836_p2 = pnand %p1835_p12, %p1829_p9 }
  0xbd   : > { %1839 = shalt.err (!%p1836_p2)
}
  0xbe   : > { %s2692_s10 = smov 8   ;;  %s2693_s5 = smov 128  }
  0xbf   : > { %1574 = dma.hbm_to_vmem [thread:$0]  (!%p2295_p11), %s2289_s3, 16384, %s2284_s4, %s270_s17, %s2693_s5, %s2693_s5, %s2692_s10  }
  0xc0   : > { %s1156_s27 = sshll.u32 %s2000_s29, 3  ;;  %s1157_s2 = sshll.u32 %s2004_s30, 4 }
  0xc1   : > { %s296_s20 = scalar_lea.vmem [#allocation7], %s1155_s12  ;;  %s302_s16 = sadd.s32 %s1157_s2, %s1156_s27 }
  0xc2   : > { %s306_s21 = sshll.u32 %s296_s20, 4  ;;  %s1158_s18 = sshll.u32 %s302_s16, 7  ;;  %s2336_s21 = int_to_ptr.vmem [resolvable:$true] %s306_s21 }
  0xc3   : > { %s304_s28 = scalar_lea.hbm %s2643_s1, %s1158_s18  ;;  %s2694_s0 = sand.u32 1, %s2008_s7  }
  0xc4   : > { %s293_s6 = scalar_lea.sflag [#allocation8], %s2694_s0  ;;  %s1840_s26 = scalar_lea.hbm %s304_s28, 1024 }
  0xc5   : > { %p1841_p10 = scmp.ne.s32.totalorder %s304_s28, %s1840_s26  ;;  %s1845_s15 = scalar_lea.hbm %s2643_s1, 4096 }
  0xc6   : > { %p1846_p7 = scmp.lt.u32.totalorder %s304_s28, %s2643_s1  ;;  %p1847_p13 = scmp.lt.u32.totalorder %s1845_s15, %s1840_s26 }
  0xc7   : > { %p1843_p0 = pnand %p1841_p10, %p1812_p6  ;;  %p1849_p3 = scmp.lt.u32.totalorder %s1840_s26, %s304_s28 }
  0xc8   : > { %p1848_p1 = por %p1847_p13, %p1846_p7 }
  0xc9   : > { %p1844_p4 = pneg %p1843_p0 }
  0xca   : > { %p1850_p9 = por %p1849_p3, %p1848_p1 }
  0xcc   : > { %p1851_p5 = pnand %p1850_p9, %p1844_p4 }
  0xce   : > { %1854 = shalt.err (!%p1851_p5)
}
  0xcf   : > { %s1855_s0 = scalar_lea.vmem %s2336_s21, 1024  ;;  %s2017_s10 = smov [#allocation7]  }
  0xd0   : > { %p1856_p8 = scmp.ne.s32.totalorder %s2336_s21, %s1855_s0  ;;  %s1860_s5 = sshll.u32 %s2017_s10, 4  ;;  %s1861_s5 = int_to_ptr.vmem [resolvable:$false] %s1860_s5 }
  0xd1   : > { %s1862_s27 = scalar_lea.vmem %s1861_s5, 2048  ;;  %p1863_p10 = scmp.lt.s32.totalorder %s2336_s21, %s1861_s5 }
  0xd2   : > { %p1858_p12 = pnand %p1856_p8, %p1812_p6  ;;  %p1864_p0 = scmp.lt.s32.totalorder %s1862_s27, %s1855_s0 }
  0xd4   : > { %p1859_p2 = pneg %p1858_p12  ;;  %p1865_p7 = por %p1864_p0, %p1863_p10 }
  0xd6   : > { %p1866_p13 = pnand %p1865_p7, %p1859_p2 }
  0xd8   : > { %1869 = shalt.err (!%p1866_p13)
}
  0xd9   : > { %1577 = dma.hbm_to_vmem [thread:$0]  (!%p2295_p11), %s304_s28, 1024, %s2336_s21, %s293_s6  }
  0xda   : > { %p2695_p4 = scmp.ne.s32.totalorder %s2678_s14, 0 }
  0xdb   : > { %s317_s26 = sand.u32 (!%p2695_p4), 1, %s1984_s25   ;;  %p2696_p6 = scmp.ne.s32.totalorder (!%p2695_p4), %s2673_s11, 0 }
  0xdc   : > { %315 = sbr.rel (%p2695_p4) target bundleno = 1149 (0x47d), region = 44  ;;  %s1160_s2 = sshll.u32 (!%p2695_p4), %s317_s26, 10 }
  0xdd   : > { %s318_s20 = scalar_lea.sflag (!%p2695_p4), [#allocation5], %s317_s26  ;;  %s2364_s16 = scalar_lea.vmem (!%p2695_p4), [#allocation4], %s1160_s2 }
  0xe3   : > { %1943 = dma.done.wait (%p2696_p6), %s318_s20, 16384  }
  0xe4   : > { %1945 = vsyncadd (%p2696_p6), %s318_s20, 4294950912  ;;  %s326_s19 = sand.u32 1, %s2115_s8   ;;  %s1161_s18 = sshll.u32 %s317_s26, 6 }
  0xe5   : > { %s327_s6 = scalar_lea.sflag [#allocation8], %s326_s19  ;;  %s2371_s28 = scalar_lea.vmem [#allocation7], %s1161_s18 }
  0xe6   : > { %1947 = dma.done.wait (%p2696_p6), %s327_s6, 1024  }
  0xe7   : > { %1949 = vsyncadd (%p2696_p6), %s327_s6, 4294966272  ;;  %p2697_p11 = scmp.eq.s32.totalorder %s2115_s8, 0 }
  0xe9   : > { %1951 = dma.done.wait (%p2697_p11), [#allocation8], 16   ;;  %p2698_p1 = pmov %p2697_p11 }
  0xeb   : > { %1953 = vsyncadd (%p2698_p1), [#allocation8], 4294967280  ;;  %p2699_p3 = pmov %p2698_p1 }
  0xec   : > { %p2700_p9 = pmov %p2698_p1 }
  0xed   : > { %1955 = dma.done.wait (%p2699_p3), [#allocation11], 2064  }
  0xee   : > { %1957 = vsyncadd (%p2700_p9), [#allocation11], 4294965232  ;;  %p2701_p5 = pmov %p2698_p1 }
  0xef   : > { %p2702_p8 = pmov %p2698_p1 }
  0xf0   : > { %1959 = dma.done.wait (%p2701_p5), [#allocation14], 16  }
  0xf1   : > { %1961 = vsyncadd (%p2702_p8), [#allocation14], 4294967280  ;;  %s377_s11 = sand.u32 1, %s1972_s22   ;;  %s2703_s24 = sld [smem:[#allocation24_spill]] }
  0xf2   : > { %s2392_s14 = sshll.u32 %s377_s11, 3 }
  0xf3   : > { %s379_s21 = scalar_lea.vmem [#allocation15], %s2392_s14 }
  0xf7   : > { %p1167_p12 = scmp.ne.s32.totalorder %s2703_s24, 0 }
  0xf8   : > { %vm387_vm0 = vcmask (!%p1167_p12), 7168   ;;  %v2018_v0 = vmov (!%p1167_p12), 0.0  }
  0xf9   : > { %385 = sbr.rel (%p1167_p12) target bundleno = 256 (0x100), region = 72  ;;  %386 = vst [vmem:[#allocation2] sm:$0xff] (!%p1167_p12), %v2018_v0  ;;  %388 = vst.msk [vmem:[#allocation3] sm:$0xff] (!%p1167_p12), %vm387_vm0, %v2018_v0 }
 0x100 PF: > { %v405_v1 = vld [vmem:[%s2364_s16 + $0x80] sm:$0xff]  ;;  %v406_v2 = vld [vmem:[%s2364_s16 + $0x88] sm:$0xff]  ;;  %v407_v12 = vld [vmem:[%s2364_s16 + $0x90] sm:$0xff]  ;;  %vm843_vm9 = vcmask 7168   ;;  %s2704_s8 = sld [smem:[#allocation24_spill]] }
 0x101   : > { %v437_v3 = vld [vmem:[%s2364_s16 + $0x180] sm:$0xff]  ;;  %v1384_v4 = vpack.c.bf16 %v406_v2, %v405_v1  ;;  %v438_v5 = vld [vmem:[%s2364_s16 + $0x188] sm:$0xff]  ;;  %v408_v14 = vld [vmem:[%s2364_s16 + $0x98] sm:$0xff] }
 0x102   : > { %v389_v6 = vld [vmem:[%s2364_s16] sm:$0xff]  ;;  %v390_v7 = vld [vmem:[%s2364_s16 + $0x8] sm:$0xff]  ;;  %v1416_v8 = vpack.c.bf16 %v438_v5, %v437_v3  ;;  %v439_v15 = vld [vmem:[%s2364_s16 + $0x190] sm:$0xff]  ;;  %v1388_v17 = vpack.c.bf16 %v408_v14, %v407_v12 }
 0x103   : > { %v1386_v9 = vpack.c.bf16 %v390_v7, %v389_v6  ;;  %v421_v10 = vld [vmem:[%s2364_s16 + $0x100] sm:$0xff]  ;;  %v422_v11 = vld [vmem:[%s2364_s16 + $0x108] sm:$0xff]  ;;  %1385 = vmatprep.subr.bf16.mxu0 %v1384_v4  ;;  %v440_v16 = vld [vmem:[%s2364_s16 + $0x198] sm:$0xff] }
 0x104   : > { %v1418_v13 = vpack.c.bf16 %v422_v11, %v421_v10  ;;  %1417 = vmatprep.subr.bf16.mxu1 %v1416_v8  ;;  %v1420_v18 = vpack.c.bf16 %v440_v16, %v439_v15  ;;  %v391_v19 = vld [vmem:[%s2364_s16 + $0x10] sm:$0xff]  ;;  %v392_v20 = vld [vmem:[%s2364_s16 + $0x18] sm:$0xff]  ;;  %v409_v24 = vld [vmem:[%s2364_s16 + $0xa0] sm:$0xff] }
 0x105   : > { %1387 = vmatpush3.bf16.msra.mxu0 %v1386_v9  ;;  %v423_v21 = vld [vmem:[%s2364_s16 + $0x110] sm:$0xff]  ;;  %v1390_v22 = vpack.c.bf16 %v392_v20, %v391_v19  ;;  %v424_v23 = vld [vmem:[%s2364_s16 + $0x118] sm:$0xff]  ;;  %v410_v25 = vld [vmem:[%s2364_s16 + $0xa8] sm:$0xff] }
 0x106   : > { %1419 = vmatpush3.bf16.msra.mxu1 %v1418_v13  ;;  %1389 = vmatprep.subr.bf16.mxu0 %v1388_v17  ;;  %v1422_v26 = vpack.c.bf16 %v424_v23, %v423_v21  ;;  %v1392_v27 = vpack.c.bf16 %v410_v25, %v409_v24  ;;  %v441_v28 = vld [vmem:[%s2364_s16 + $0x1a0] sm:$0xff]  ;;  %v442_v29 = vld [vmem:[%s2364_s16 + $0x1a8] sm:$0xff]  ;;  %v411_v36 = vld [vmem:[%s2364_s16 + $0xb0] sm:$0xff]  ;;  %v2019_v25 = vmov 1.0   ;;  %p1184_p2 = scmp.ne.s32.totalorder %s2704_s8, 1 }
 0x107   : > { %1421 = vmatprep.subr.bf16.mxu1 %v1420_v18  ;;  %v393_v30 = vld [vmem:[%s2364_s16 + $0x20] sm:$0xff]  ;;  %v1424_v31 = vpack.c.bf16 %v442_v29, %v441_v28  ;;  %v394_v32 = vld [vmem:[%s2364_s16 + $0x28] sm:$0xff]  ;;  %v412_v37 = vld [vmem:[%s2364_s16 + $0xb8] sm:$0xff]  ;;  %vm2023_vm10 = vmmov (!%p1184_p2), 0  }
 0x108   : > { %v425_v33 = vld [vmem:[%s2364_s16 + $0x120] sm:$0xff]  ;;  %v426_v34 = vld [vmem:[%s2364_s16 + $0x128] sm:$0xff]  ;;  %v1394_v35 = vpack.c.bf16 %v394_v32, %v393_v30  ;;  %v443_v38 = vld [vmem:[%s2364_s16 + $0x1b0] sm:$0xff]  ;;  %v1396_v40 = vpack.c.bf16 %v412_v37, %v411_v36 }
 0x109   : > { %1391 = vmatpush3.bf16.msra.mxu0 %v1390_v22  ;;  %v1426_v39 = vpack.c.bf16 %v426_v34, %v425_v33  ;;  %v444_v41 = vld [vmem:[%s2364_s16 + $0x1b8] sm:$0xff]  ;;  %v395_v42 = vld [vmem:[%s2364_s16 + $0x30] sm:$0xff]  ;;  %v413_v47 = vld [vmem:[%s2364_s16 + $0xc0] sm:$0xff] }
 0x10a   : > { %1423 = vmatpush3.bf16.msra.mxu1 %v1422_v26  ;;  %1393 = vmatprep.subr.bf16.mxu0 %v1392_v27  ;;  %v396_v43 = vld [vmem:[%s2364_s16 + $0x38] sm:$0xff]  ;;  %v1428_v44 = vpack.c.bf16 %v444_v41, %v443_v38  ;;  %v427_v45 = vld [vmem:[%s2364_s16 + $0x130] sm:$0xff]  ;;  %v414_v48 = vld [vmem:[%s2364_s16 + $0xc8] sm:$0xff] }
 0x10b   : > { %1425 = vmatprep.subr.bf16.mxu1 %v1424_v31  ;;  %v428_v46 = vld [vmem:[%s2364_s16 + $0x138] sm:$0xff]  ;;  %v445_v49 = vld [vmem:[%s2364_s16 + $0x1c0] sm:$0xff]  ;;  %v446_v50 = vld [vmem:[%s2364_s16 + $0x1c8] sm:$0xff]  ;;  %v1398_v51 = vpack.c.bf16 %v396_v43, %v395_v42  ;;  %v1400_v53 = vpack.c.bf16 %v414_v48, %v413_v47 }
 0x10c   : > { %v1430_v52 = vpack.c.bf16 %v428_v46, %v427_v45  ;;  %v397_v54 = vld [vmem:[%s2364_s16 + $0x40] sm:$0xff]  ;;  %v398_v55 = vld [vmem:[%s2364_s16 + $0x48] sm:$0xff]  ;;  %v1432_v57 = vpack.c.bf16 %v446_v50, %v445_v49  ;;  %v415_v59 = vld [vmem:[%s2364_s16 + $0xd0] sm:$0xff] }
 0x10d   : > { %1395 = vmatpush3.bf16.msra.mxu0 %v1394_v35  ;;  %v429_v56 = vld [vmem:[%s2364_s16 + $0x140] sm:$0xff]  ;;  %v430_v58 = vld [vmem:[%s2364_s16 + $0x148] sm:$0xff]  ;;  %v416_v60 = vld [vmem:[%s2364_s16 + $0xd8] sm:$0xff]  ;;  %v1402_v63 = vpack.c.bf16 %v398_v55, %v397_v54 }
 0x10e   : > { %1427 = vmatpush3.bf16.msra.mxu1 %v1426_v39  ;;  %1397 = vmatprep.subr.bf16.mxu0 %v1396_v40  ;;  %v447_v61 = vld [vmem:[%s2364_s16 + $0x1d0] sm:$0xff]  ;;  %v448_v62 = vld [vmem:[%s2364_s16 + $0x1d8] sm:$0xff]  ;;  %v1434_v0 = vpack.c.bf16 %v430_v58, %v429_v56  ;;  %v1404_v1 = vpack.c.bf16 %v416_v60, %v415_v59  ;;  %v417_v7 = vld [vmem:[%s2364_s16 + $0xe0] sm:$0xff]  ;;  %v2020_v40 = vmov 0.0  }
 0x10f   : > { %1429 = vmatprep.subr.bf16.mxu1 %v1428_v44  ;;  %v399_v2 = vld [vmem:[%s2364_s16 + $0x50] sm:$0xff]  ;;  %v400_v3 = vld [vmem:[%s2364_s16 + $0x58] sm:$0xff]  ;;  %v1436_v5 = vpack.c.bf16 %v448_v62, %v447_v61  ;;  %v418_v8 = vld [vmem:[%s2364_s16 + $0xe8] sm:$0xff] }
 0x110   : > { %v431_v4 = vld [vmem:[%s2364_s16 + $0x150] sm:$0xff]  ;;  %v432_v6 = vld [vmem:[%s2364_s16 + $0x158] sm:$0xff]  ;;  %v449_v9 = vld [vmem:[%s2364_s16 + $0x1e0] sm:$0xff]  ;;  %v1406_v11 = vpack.c.bf16 %v400_v3, %v399_v2  ;;  %v1408_v15 = vpack.c.bf16 %v418_v8, %v417_v7 }
 0x111   : > { %1399 = vmatpush3.bf16.msra.mxu0 %v1398_v51  ;;  %v450_v10 = vld [vmem:[%s2364_s16 + $0x1e8] sm:$0xff]  ;;  %v401_v12 = vld [vmem:[%s2364_s16 + $0x60] sm:$0xff]  ;;  %v1438_v14 = vpack.c.bf16 %v432_v6, %v431_v4  ;;  %v419_v20 = vld [vmem:[%s2364_s16 + $0xf0] sm:$0xff] }
 0x112   : > { %1431 = vmatpush3.bf16.msra.mxu1 %v1430_v52  ;;  %1401 = vmatprep.subr.bf16.mxu0 %v1400_v53  ;;  %v402_v13 = vld [vmem:[%s2364_s16 + $0x68] sm:$0xff]  ;;  %v433_v16 = vld [vmem:[%s2364_s16 + $0x160] sm:$0xff]  ;;  %v1440_v19 = vpack.c.bf16 %v450_v10, %v449_v9  ;;  %v420_v21 = vld [vmem:[%s2364_s16 + $0xf8] sm:$0xff] }
 0x113   : > { %1433 = vmatprep.subr.bf16.mxu1 %v1432_v57  ;;  %v434_v17 = vld [vmem:[%s2364_s16 + $0x168] sm:$0xff]  ;;  %v2456_v22 = vld [vmem:[%s2371_s28 + $0x18] sm:$0xff]  ;;  %v451_v23 = vld [vmem:[%s2364_s16 + $0x1f0] sm:$0xff]  ;;  %v1410_v26 = vpack.c.bf16 %v402_v13, %v401_v12  ;;  %v1412_v29 = vpack.c.bf16 %v420_v21, %v419_v20 }
 0x114   : > { %v518_v18 = vld [vmem:[%s2371_s28 + $0x8] sm:$0xff]  ;;  %v452_v24 = vld [vmem:[%s2364_s16 + $0x1f8] sm:$0xff]  ;;  %vm528_vm2 = vcmp.gt.f32.partialorder %v2456_v22, 0.0  ;;  %v517_v27 = vld [vmem:[%s2371_s28] sm:$0xff]  ;;  %v1442_v28 = vpack.c.bf16 %v434_v17, %v433_v16 }
 0x115   : > { %1403 = vmatpush3.bf16.msra.mxu0 %v1402_v63  ;;  %vm526_vm1 = vcmp.gt.f32.partialorder %v518_v18, 0.0  ;;  %1178 = vmatprep.mubr.msk.f32.mxu1 %vm528_vm2, %v2019_v25  ;;  %v403_v30 = vld [vmem:[%s2364_s16 + $0x70] sm:$0xff]  ;;  %v404_v31 = vld [vmem:[%s2364_s16 + $0x78] sm:$0xff]  ;;  %v1444_v33 = vpack.c.bf16 %v452_v24, %v451_v23  ;;  %v469_v35 = vld [vmem:[%s2364_s16 + $0x280] sm:$0xff]  ;;  %vm525_vm3 = vcmp.gt.f32.partialorder %v517_v27, 0.0  ;;  %v1171_v7 = vsel %vm528_vm2, 1.0, %v2020_v40 }
 0x116   : > { %1435 = vmatpush3.bf16.msra.mxu1 %v1434_v0  ;;  %1405 = vmatprep.subr.bf16.mxu0 %v1404_v1  ;;  %v435_v32 = vld [vmem:[%s2364_s16 + $0x170] sm:$0xff]  ;;  %v436_v34 = vld [vmem:[%s2364_s16 + $0x178] sm:$0xff]  ;;  %v470_v36 = vld [vmem:[%s2364_s16 + $0x288] sm:$0xff]  ;;  %v1414_v39 = vpack.c.bf16 %v404_v31, %v403_v30  ;;  %v1168_v41 = vsel %vm525_vm3, 1.0, %v2020_v40  ;;  %v1169_v42 = vsel %vm526_vm1, 1.0, %v2020_v40 }
 0x117   : > { %1437 = vmatprep.subr.bf16.mxu1 %v1436_v5  ;;  %1176 = vmatprep.mubr.msk.f32.mxu0 %vm526_vm1, %v2019_v25  ;;  %v501_v37 = vld [vmem:[%s2364_s16 + $0x380] sm:$0xff]  ;;  %v502_v38 = vld [vmem:[%s2364_s16 + $0x388] sm:$0xff]  ;;  %v519_v43 = vld [vmem:[%s2371_s28 + $0x10] sm:$0xff]  ;;  %v1446_v44 = vpack.c.bf16 %v436_v34, %v435_v32  ;;  %v1448_v45 = vpack.c.bf16 %v470_v36, %v469_v35  ;;  %v833_v53 = vadd.f32 %v1169_v42, %v1168_v41 }
 0x118   : > { %v453_v46 = vld [vmem:[%s2364_s16 + $0x200] sm:$0xff]  ;;  %v454_v47 = vld [vmem:[%s2364_s16 + $0x208] sm:$0xff]  ;;  %v1480_v49 = vpack.c.bf16 %v502_v38, %v501_v37  ;;  %v471_v51 = vld [vmem:[%s2364_s16 + $0x290] sm:$0xff]  ;;  %vm527_vm4 = vcmp.gt.f32.partialorder %v519_v43, 0.0 }
 0x119   : > { %1407 = vmatpush3.bf16.msra.mxu0 %v1406_v11  ;;  %v485_v48 = vld [vmem:[%s2364_s16 + $0x300] sm:$0xff]  ;;  %v486_v50 = vld [vmem:[%s2364_s16 + $0x308] sm:$0xff]  ;;  %v472_v52 = vld [vmem:[%s2364_s16 + $0x298] sm:$0xff]  ;;  %v1170_v56 = vsel %vm527_vm4, 1.0, %v2020_v40  ;;  %v1450_v57 = vpack.c.bf16 %v454_v47, %v453_v46 }
 0x11a   : > { %1439 = vmatpush3.bf16.msra.mxu1 %v1438_v14  ;;  %1409 = vmatprep.subr.bf16.mxu0 %v1408_v15  ;;  %v503_v54 = vld [vmem:[%s2364_s16 + $0x390] sm:$0xff]  ;;  %v504_v55 = vld [vmem:[%s2364_s16 + $0x398] sm:$0xff]  ;;  %v1482_v58 = vpack.c.bf16 %v486_v50, %v485_v48  ;;  %v1452_v59 = vpack.c.bf16 %v472_v52, %v471_v51  ;;  %v473_v1 = vld [vmem:[%s2364_s16 + $0x2a0] sm:$0xff]  ;;  %v834_v3 = vadd.f32 %v1170_v56, %v833_v53 }
 0x11b   : > { %1441 = vmatprep.subr.bf16.mxu1 %v1440_v19  ;;  %v455_v60 = vld [vmem:[%s2364_s16 + $0x210] sm:$0xff]  ;;  %v456_v61 = vld [vmem:[%s2364_s16 + $0x218] sm:$0xff]  ;;  %v1484_v63 = vpack.c.bf16 %v504_v55, %v503_v54  ;;  %v474_v2 = vld [vmem:[%s2364_s16 + $0x2a8] sm:$0xff] }
 0x11c   : > { %v487_v62 = vld [vmem:[%s2364_s16 + $0x310] sm:$0xff]  ;;  %v488_v0 = vld [vmem:[%s2364_s16 + $0x318] sm:$0xff]  ;;  %v505_v4 = vld [vmem:[%s2364_s16 + $0x3a0] sm:$0xff]  ;;  %v1454_v8 = vpack.c.bf16 %v456_v61, %v455_v60  ;;  %v1456_v10 = vpack.c.bf16 %v474_v2, %v473_v1  ;;  %v835_v18 = vadd.f32 %v1171_v7, %v834_v3 }
 0x11d   : > { %1411 = vmatpush3.bf16.msra.mxu0 %v1410_v26  ;;  %v506_v5 = vld [vmem:[%s2364_s16 + $0x3a8] sm:$0xff]  ;;  %v2501_v6 = vld [vmem:[%s2371_s28 + $0x20] sm:$0xff]  ;;  %v1486_v9 = vpack.c.bf16 %v488_v0, %v487_v62  ;;  %v475_v16 = vld [vmem:[%s2364_s16 + $0x2b0] sm:$0xff] }
 0x11e   : > { %1443 = vmatpush3.bf16.msra.mxu1 %v1442_v28  ;;  %1413 = vmatprep.subr.bf16.mxu0 %v1412_v29  ;;  %v457_v11 = vld [vmem:[%s2364_s16 + $0x220] sm:$0xff]  ;;  %v458_v12 = vld [vmem:[%s2364_s16 + $0x228] sm:$0xff]  ;;  %v1488_v14 = vpack.c.bf16 %v506_v5, %v505_v4  ;;  %v476_v17 = vld [vmem:[%s2364_s16 + $0x2b8] sm:$0xff]  ;;  %vm529_vm5 = vcmp.gt.f32.partialorder %v2501_v6, 0.0 }
 0x11f   : > { %1445 = vmatprep.subr.bf16.mxu1 %v1444_v33  ;;  %v489_v13 = vld [vmem:[%s2364_s16 + $0x320] sm:$0xff]  ;;  %v490_v15 = vld [vmem:[%s2364_s16 + $0x328] sm:$0xff]  ;;  %v507_v19 = vld [vmem:[%s2364_s16 + $0x3b0] sm:$0xff]  ;;  %v1172_v21 = vsel %vm529_vm5, 1.0, %v2020_v40  ;;  %v1458_v22 = vpack.c.bf16 %v458_v12, %v457_v11  ;;  %v1460_v24 = vpack.c.bf16 %v476_v17, %v475_v16 }
 0x120   : > { %v508_v20 = vld [vmem:[%s2364_s16 + $0x3b8] sm:$0xff]  ;;  %v1490_v23 = vpack.c.bf16 %v490_v15, %v489_v13  ;;  %v459_v26 = vld [vmem:[%s2364_s16 + $0x230] sm:$0xff]  ;;  %v477_v31 = vld [vmem:[%s2364_s16 + $0x2c0] sm:$0xff]  ;;  %v836_v33 = vadd.f32 %v1172_v21, %v835_v18 }
 0x121   : > { %1415 = vmatpush3.bf16.msra.mxu0 %v1414_v39  ;;  %v460_v27 = vld [vmem:[%s2364_s16 + $0x238] sm:$0xff]  ;;  %v491_v28 = vld [vmem:[%s2364_s16 + $0x330] sm:$0xff]  ;;  %v1492_v29 = vpack.c.bf16 %v508_v20, %v507_v19  ;;  %v478_v32 = vld [vmem:[%s2364_s16 + $0x2c8] sm:$0xff] }
 0x122   : > { %1447 = vmatpush3.bf16.msra.mxu1 %v1446_v44  ;;  %1449 = vmatprep.subr.bf16.mxu0 %v1448_v45  ;;  %v492_v30 = vld [vmem:[%s2364_s16 + $0x338] sm:$0xff]  ;;  %v509_v34 = vld [vmem:[%s2364_s16 + $0x3c0] sm:$0xff]  ;;  %v510_v35 = vld [vmem:[%s2364_s16 + $0x3c8] sm:$0xff]  ;;  %v1462_v36 = vpack.c.bf16 %v460_v27, %v459_v26  ;;  %v1464_v42 = vpack.c.bf16 %v478_v32, %v477_v31 }
 0x123   : > { %1481 = vmatprep.subr.bf16.mxu1 %v1480_v49  ;;  %v461_v37 = vld [vmem:[%s2364_s16 + $0x240] sm:$0xff]  ;;  %v462_v38 = vld [vmem:[%s2364_s16 + $0x248] sm:$0xff]  ;;  %v1494_v41 = vpack.c.bf16 %v492_v30, %v491_v28  ;;  %v524_v44 = vld [vmem:[%s2371_s28 + $0x38] sm:$0xff]  ;;  %v1496_v46 = vpack.c.bf16 %v510_v35, %v509_v34 }
 0x124   : > { %1177 = vmatmul.mubr.msk.f32.vlgmr.msra.gmra.mrb[0].mxu0 %vm525_vm3, %v2019_v25  ;;  %v522_v39 = vld [vmem:[%s2371_s28 + $0x28] sm:$0xff]  ;;  %v493_v43 = vld [vmem:[%s2364_s16 + $0x340] sm:$0xff]  ;;  %v2534_v45 = vld [vmem:[%s2371_s28 + $0x30] sm:$0xff]  ;;  %vm532_vm7 = vcmp.gt.f32.partialorder %v524_v44, 0.0  ;;  %v1466_v55 = vpack.c.bf16 %v462_v38, %v461_v37 }
 0x125   : > { %1179 = vmatmul.mubr.msk.f32.vlgmr.msra.gmra.mrb[0].mxu1 %vm527_vm4, %v2019_v25  ;;  %1451 = vmatpush3.bf16.msra.mxu0 %v1450_v57  ;;  %vm530_vm6 = vcmp.gt.f32.partialorder %v522_v39, 0.0  ;;  %v494_v47 = vld [vmem:[%s2364_s16 + $0x348] sm:$0xff]  ;;  %v479_v48 = vld [vmem:[%s2364_s16 + $0x2d0] sm:$0xff]  ;;  %v480_v49 = vld [vmem:[%s2364_s16 + $0x2d8] sm:$0xff]  ;;  %vm531_vm8 = vcmp.gt.f32.partialorder %v2534_v45, 0.0  ;;  %v1175_v56 = vsel %vm532_vm7, 1.0, %v2020_v40 }
 0x126   : > { %1483 = vmatpush3.bf16.msra.mxu1 %v1482_v58  ;;  %1453 = vmatprep.subr.bf16.mxu0 %v1452_v59  ;;  %v1173_v50 = vsel %vm530_vm6, 1.0, %v2020_v40  ;;  %v511_v51 = vld [vmem:[%s2364_s16 + $0x3d0] sm:$0xff]  ;;  %v512_v52 = vld [vmem:[%s2364_s16 + $0x3d8] sm:$0xff]  ;;  %v1174_v53 = vsel %vm531_vm8, 1.0, %v2020_v40  ;;  %v1498_v57 = vpack.c.bf16 %v494_v47, %v493_v43  ;;  %v1468_v58 = vpack.c.bf16 %v480_v49, %v479_v48  ;;  %v481_v1 = vld [vmem:[%s2364_s16 + $0x2e0] sm:$0xff] }
 0x127   : > { %1485 = vmatprep.subr.bf16.mxu1 %v1484_v63  ;;  %1180 = vmatprep.mubr.msk.f32.mxu0 %vm530_vm6, %v2019_v25  ;;  %v837_v54 = vadd.f32 %v1173_v50, %v836_v33  ;;  %v463_v59 = vld [vmem:[%s2364_s16 + $0x250] sm:$0xff]  ;;  %v464_v60 = vld [vmem:[%s2364_s16 + $0x258] sm:$0xff]  ;;  %v1500_v63 = vpack.c.bf16 %v512_v52, %v511_v51  ;;  %v482_v2 = vld [vmem:[%s2364_s16 + $0x2e8] sm:$0xff]  ;;  %v2021_v49 = vmov (!%p1184_p2), 0  }
 0x128   : > { %1182 = vmatprep.mubr.msk.f32.mxu1 %vm532_vm7, %v2019_v25  ;;  %v495_v61 = vld [vmem:[%s2364_s16 + $0x350] sm:$0xff]  ;;  %v496_v0 = vld [vmem:[%s2364_s16 + $0x358] sm:$0xff]  ;;  %v513_v3 = vld [vmem:[%s2364_s16 + $0x3e0] sm:$0xff]  ;;  %v1470_v5 = vpack.c.bf16 %v464_v60, %v463_v59  ;;  %1693 = vset.pattern.permute.xlu0 (!%p1184_p2), %v2021_v49 }
 0x129   : > { %1455 = vmatpush3.bf16.msra.mxu0 %v1454_v8  ;;  %v838_v62 = vadd.f32 %v1174_v53, %v837_v54  ;;  %v514_v40 = vld [vmem:[%s2364_s16 + $0x3e8] sm:$0xff]  ;;  %v1502_v7 = vpack.c.bf16 %v496_v0, %v495_v61  ;;  %v1472_v8 = vpack.c.bf16 %v482_v2, %v481_v1  ;;  %v497_v11 = vld [vmem:[%s2364_s16 + $0x360] sm:$0xff]  ;;  %v484_v15 = vld [vmem:[%s2364_s16 + $0x2f8] sm:$0xff] }
 0x12a   : > { %1487 = vmatpush3.bf16.msra.mxu1 %v1486_v9  ;;  %1457 = vmatprep.subr.bf16.mxu0 %v1456_v10  ;;  %v465_v9 = vld [vmem:[%s2364_s16 + $0x260] sm:$0xff]  ;;  %v466_v10 = vld [vmem:[%s2364_s16 + $0x268] sm:$0xff]  ;;  %v1504_v12 = vpack.c.bf16 %v514_v40, %v513_v3  ;;  %v515_v16 = vld [vmem:[%s2364_s16 + $0x3f0] sm:$0xff] }
 0x12b   : > { %1489 = vmatprep.subr.bf16.mxu1 %v1488_v14  ;;  %v839_v4 = vadd.f32 %v1175_v56, %v838_v62  ;;  %v498_v13 = vld [vmem:[%s2364_s16 + $0x368] sm:$0xff]  ;;  %v483_v14 = vld [vmem:[%s2364_s16 + $0x2f0] sm:$0xff]  ;;  %v516_v17 = vld [vmem:[%s2364_s16 + $0x3f8] sm:$0xff]  ;;  %v1474_v18 = vpack.c.bf16 %v466_v10, %v465_v9 }
 0x12c   : > { %v1506_v19 = vpack.c.bf16 %v498_v13, %v497_v11  ;;  %v1476_v20 = vpack.c.bf16 %v484_v15, %v483_v14  ;;  %v467_v21 = vld [vmem:[%s2364_s16 + $0x270] sm:$0xff]  ;;  %v500_v26 = vld [vmem:[%s2364_s16 + $0x378] sm:$0xff]  ;;  %v891_v62 = vld [vmem:[#allocation12 + $0x20] sm:$0xff] (!%p1184_p2)  ;;  %v2024_v13 = vmov (!%p1184_p2), 0.0  }
 0x12d   : > { %1459 = vmatpush3.bf16.msra.mxu0 %v1458_v22  ;;  %840 = vadd.xlane.f32.xlu0 %v839_v4  ;;  %v468_v22 = vld [vmem:[%s2364_s16 + $0x278] sm:$0xff]  ;;  %v888_v56 = vld [vmem:[#allocation12 + $0x8] sm:$0xff] (!%p1184_p2)  ;;  %v899_v15 = vld [vmem:[#allocation12 + $0x60] sm:$0xff] (!%p1184_p2) }
 0x12e   : > { %1491 = vmatpush3.bf16.msra.mxu1 %v1490_v23  ;;  %1461 = vmatprep.subr.bf16.mxu0 %v1460_v24  ;;  %v1508_v23 = vpack.c.bf16 %v516_v17, %v515_v16  ;;  %v499_v24 = vld [vmem:[%s2364_s16 + $0x370] sm:$0xff]  ;;  %v1478_v27 = vpack.c.bf16 %v468_v22, %v467_v21  ;;  %v890_v60 = vld [vmem:[#allocation12 + $0x18] sm:$0xff] (!%p1184_p2) }
 0x12f   : > { %1493 = vmatprep.subr.bf16.mxu1 %v1492_v29  ;;  %v1510_v28 = vpack.c.bf16 %v500_v26, %v499_v24  ;;  %v832_v29 = vld [vmem:[#allocation3] sm:$0xff]  ;;  %v896_v9 = vld [vmem:[#allocation12 + $0x48] sm:$0xff] (!%p1184_p2)  ;;  %v1185_v26 = vld [vmem:[#allocation9] ss:$0 sm:$0xff] (!%p1184_p2) }
 0x130   : > { %v893_v4 = vld [vmem:[#allocation12 + $0x30] sm:$0xff] (!%p1184_p2)  ;;  %v900_v16 = vld [vmem:[#allocation12 + $0x68] sm:$0xff] (!%p1184_p2) }
 0x131   : > { %1463 = vmatpush3.bf16.msra.mxu0 %v1462_v36  ;;  %v897_v11 = vld [vmem:[#allocation12 + $0x50] sm:$0xff] (!%p1184_p2)  ;;  %v1531_v17 = vpack.c.bf16 (!%p1184_p2), %v900_v16, %v899_v15 }
 0x132   : > { %1495 = vmatpush3.bf16.msra.mxu1 %v1494_v41  ;;  %1465 = vmatprep.subr.bf16.mxu0 %v1464_v42 }
 0x133   : > { %1497 = vmatprep.subr.bf16.mxu1 %v1496_v46 }
 0x135   : > { %1467 = vmatpush3.bf16.msra.mxu0 %v1466_v55  ;;  %v887_v55 = vld [vmem:[#allocation12] sm:$0xff] (!%p1184_p2) }
 0x136   : > { %1499 = vmatpush3.bf16.msra.mxu1 %v1498_v57  ;;  %1469 = vmatprep.subr.bf16.mxu0 %v1468_v58  ;;  %v889_v57 = vld [vmem:[#allocation12 + $0x10] sm:$0xff] (!%p1184_p2)  ;;  %v2022_v58 = vmov (!%p1184_p2), 0.0|0.0   ;;  %v1513_v59 = vpack.c.bf16 (!%p1184_p2), %v888_v56, %v887_v55 }
 0x137   : > { %1501 = vmatprep.subr.bf16.mxu1 %v1500_v63  ;;  %v1516_v61 = vpack.c.bf16 (!%p1184_p2), %v890_v60, %v889_v57  ;;  %v892_v63 = vld [vmem:[#allocation12 + $0x28] sm:$0xff] (!%p1184_p2) }
 0x138   : > { %v1519_v0 = vpack.c.bf16 (!%p1184_p2), %v892_v63, %v891_v62 }
 0x139   : > { %1471 = vmatpush3.bf16.msra.mxu0 %v1470_v5  ;;  %v894_v5 = vld [vmem:[#allocation12 + $0x38] sm:$0xff] (!%p1184_p2) }
 0x13a   : > { %1503 = vmatpush3.bf16.msra.mxu1 %v1502_v7  ;;  %1473 = vmatprep.subr.bf16.mxu0 %v1472_v8  ;;  %v1522_v7 = vpack.c.bf16 (!%p1184_p2), %v894_v5, %v893_v4  ;;  %v895_v8 = vld [vmem:[#allocation12 + $0x40] sm:$0xff] (!%p1184_p2) }
 0x13b   : > { %1505 = vmatprep.subr.bf16.mxu1 %v1504_v12  ;;  %v1525_v10 = vpack.c.bf16 (!%p1184_p2), %v896_v9, %v895_v8  ;;  %v898_v12 = vld [vmem:[#allocation12 + $0x58] sm:$0xff] (!%p1184_p2) }
 0x13c   : > { %v1528_v14 = vpack.c.bf16 (!%p1184_p2), %v898_v12, %v897_v11 }
 0x13d   : > { %1475 = vmatpush3.bf16.msra.mxu0 %v1474_v18  ;;  %v901_v18 = vld [vmem:[#allocation12 + $0x70] sm:$0xff] (!%p1184_p2) }
 0x13e   : > { %1507 = vmatpush3.bf16.msra.mxu1 %v1506_v19  ;;  %1477 = vmatprep.subr.bf16.mxu0 %v1476_v20  ;;  %v902_v19 = vld [vmem:[#allocation12 + $0x78] sm:$0xff] (!%p1184_p2) }
 0x13f   : > { %1509 = vmatprep.subr.bf16.mxu1 %v1508_v23  ;;  %v1534_v20 = vpack.c.bf16 (!%p1184_p2), %v902_v19, %v901_v18 }
 0x141   : > { %1479 = vmatpush3.bf16.msra.mxu0 %v1478_v27 }
 0x142   : > { %1511 = vmatpush3.bf16.msra.mxu1 %v1510_v28  ;;  %1512 = vmatprep.subr.bf16.mxu0 (!%p1184_p2), %v2022_v58  ;;  %v1186_v28 = vld [vmem:[#allocation10] ss:$0 sm:$0xff] (!%p1184_p2) }
 0x144   : > { %1181 = vmatmul.mubr.msk.f32.vlgmr.msra.gmra.mrb[2].mxu0 %vm529_vm5, %v2019_v25 }
 0x145   : > { %1183 = vmatmul.mubr.msk.f32.vlgmr.msra.gmra.mrb[2].mxu1 %vm531_vm8, %v2019_v25  ;;  %v549_v25 = vld [vmem:[#allocation2] sm:$0xff]  ;;  %1514 = vmatpush3.bf16.msra.mxu0 (!%p1184_p2), %v1513_v59 }
 0x146   : > { %1515 = vmatprep.subr.bf16.mxu0 (!%p1184_p2), %v2022_v58  ;;  %1381 = vmatprep.mubr.msk.f32.mxu0 (!%p1184_p2), %vm2023_vm10, %v2024_v13 }
 0x149   : > { %1517 = vmatpush3.bf16.msra.mxu0 (!%p1184_p2), %v1516_v61 }
 0x14a   : > { %1518 = vmatprep.subr.bf16.mxu0 (!%p1184_p2), %v2022_v58 }
 0x14d   : > { %1520 = vmatpush3.bf16.msra.mxu0 (!%p1184_p2), %v1519_v0 }
 0x14e   : > { %1521 = vmatprep.subr.bf16.mxu0 (!%p1184_p2), %v2022_v58 }
 0x151   : > { %1523 = vmatpush3.bf16.msra.mxu0 (!%p1184_p2), %v1522_v7 }
 0x152   : > { %1524 = vmatprep.subr.bf16.mxu0 (!%p1184_p2), %v2022_v58 }
 0x155   : > { %1526 = vmatpush3.bf16.msra.mxu0 (!%p1184_p2), %v1525_v10 }
 0x156   : > { %1527 = vmatprep.subr.bf16.mxu0 (!%p1184_p2), %v2022_v58 }
 0x159   : > { %1529 = vmatpush3.bf16.msra.mxu0 (!%p1184_p2), %v1528_v14 }
 0x15a   : > { %1530 = vmatprep.subr.bf16.mxu0 (!%p1184_p2), %v2022_v58 }
 0x15d   : > { %1532 = vmatpush3.bf16.msra.mxu0 (!%p1184_p2), %v1531_v17 }
 0x15e   : > { %1533 = vmatprep.subr.bf16.mxu0 (!%p1184_p2), %v2022_v58 }
 0x161   : > { %1535 = vmatpush3.bf16.msra.mxu0 (!%p1184_p2), %v1534_v20 }
 0x1ba   : > { %v841_v30 = vpop.xlane.xlu0 %840 }
 0x1bb   : > { %v842_v31 = vadd.f32 %v841_v30, %v832_v29 }
 0x1bd   : > { %844 = vst.msk [vmem:[#allocation3] sm:$0xff] %vm843_vm9, %v842_v31  ;;  %v1187_v31 = vld [vmem:[#allocation13] ss:$0 sm:$0xff] (!%p1184_p2) }
 0x1c4   : > { %v849_v48 = vld [vmem:[#allocation3] sm:$0xff] (!%p1184_p2) }
 0x1c5   : > { %v850_v50 = vadd.f32 (!%p1184_p2), 1e-08, %v849_v48 }
 0x1c7   : > { %1694 = vrcp.f32 (!%p1184_p2), %v850_v50 }
 0x1d1   : > { %v1695_v51 = vpop.eup (!%p1184_p2), %1694 }
 0x1d2   : > { %855 = vperm.xlu0 (!%p1184_p2), %1693, %v1695_v51  }
 0x1f7   : > { %v1224_v32 = vpop.f32.mrb[0].mxu0 }
 0x1f8   : > { %v1259_v33 = vpop.f32.mrb[0].mxu1  ;;  %v1225_v34 = vpop.f32.mrb[1].mxu0 }
 0x1f9   : > { %v1226_v35 = vadd.f32 %v1225_v34, %v1224_v32  ;;  %v1260_v36 = vpop.f32.mrb[1].mxu1 }
 0x1fa   : > { %v1261_v37 = vadd.f32 %v1260_v36, %v1259_v33 }
 0x1fc   : > { %v687_v38 = vadd.f32 %v1261_v37, %v1226_v35 }
 0x217   : > { %v1294_v39 = vpop.f32.mrb[2].mxu0 }
 0x218   : > { %v1295_v41 = vpop.f32.mrb[3].mxu0  ;;  %v1329_v6 = vpop.f32.mrb[2].mxu1 }
 0x219   : > { %v1296_v42 = vadd.f32 %v1295_v41, %v1294_v39  ;;  %v1330_v43 = vpop.f32.mrb[3].mxu1 }
 0x21a   : > { %v1331_v44 = vadd.f32 %v1330_v43, %v1329_v6 }
 0x21b   : > { %v757_v45 = vadd.f32 %v1296_v42, %v687_v38  ;;  %848 = sbr.rel (%p1184_p2) target bundleno = 1122 (0x462), region = 76 }
 0x21d   : > { %v827_v46 = vadd.f32 %v1331_v44, %v757_v45 }
 0x21f   : > { %v830_v47 = vadd.f32 %v827_v46, %v549_v25 }
 0x221   : > { %831 = vst [vmem:[#allocation2] sm:$0xff] %v830_v47 }
 0x228   : > { %v852_v52 = vld [vmem:[#allocation2] sm:$0xff] }
 0x251   : > { %v856_v53 = vpop.permute.xlu0 %855 }
 0x252   : > { %v858_v54 = vmul.f32 %v856_v53, %v852_v52 }
 0x254   : > { %859 = vadd.xlane.f32.xlu0 %v858_v54 }
 0x2e1   : > { %v860_v1 = vpop.xlane.xlu0 %859 }
 0x2e2   : > { %v862_v2 = vmul.f32 0.0078125, %v860_v1 }
 0x2e4   : > { %v863_v3 = vsub.f32 %v858_v54, %v862_v2 }
 0x2e6   : > { %v864_v40 = vmul.f32 %v863_v3, %v863_v3 }
 0x2e8   : > { %865 = vadd.xlane.f32.xlu1 %v864_v40 }
 0x375   : > { %v866_v21 = vpop.xlane.xlu1 %865 }
 0x376   : > { %v867_v22 = vmul.f32 0.0078125, %v866_v21 }
 0x378   : > { %v868_v23 = vadd.f32 1e-05, %v867_v22 }
 0x37a   : > { %1696 = vrsqrt.f32 %v868_v23 }
 0x384   : > { %v1697_v24 = vpop.eup %1696 }
 0x385   : > { %v870_v27 = vmul.f32 %v1697_v24, %v863_v3 }
 0x387   : > { %v878_v29 = vmul.f32 %v1185_v26, %v870_v27 }
 0x389   : > { %v886_v30 = vadd.f32 %v1186_v28, %v878_v29 }
 0x38b   : > { %1382 = vmatmul.mubr.f32.vlgmr.msra.gmra.mrb[0].mxu0 %v886_v30 }
 0x45e   : > { %v976_v32 = vpop.f32.mrb[0].mxu0 }
 0x45f   : > { %v977_v33 = vadd.f32 %v1187_v31, %v976_v32  ;;  %v1383_v34 = vpop.f32.mrb[1].mxu0 }
 0x461   : > { %980 = vst [vmem:[%s379_s21] sm:$0xff] %v977_v33 }
 0x462 PF: > { %s2705_s13 = sld [smem:[#allocation25_spill]]  ;;  %s2706_s4 = sld [smem:[#allocation26_spill]] }
 0x463   : > { %s2707_s17 = sld [smem:[#allocation36_spill]]  ;;  %s995_s10 = sshll.u32 %s379_s21, 4  ;;  %s996_s10 = int_to_ptr.vmem [resolvable:$true] %s995_s10 }
 0x464   : > { %s982_s5 = scalar_lea.sflag [#allocation6], %s377_s11  ;;  %s1870_s27 = scalar_lea.vmem %s996_s10, 128 }
 0x465   : > { %p1871_p10 = scmp.ne.s32.totalorder %s996_s10, %s1870_s27  ;;  %s2025_s26 = smov [#allocation15]  }
 0x466   : > { %s1874_s2 = sshll.u32 %s2025_s26, 4  ;;  %s1875_s2 = int_to_ptr.vmem [resolvable:$false] %s1874_s2 }
 0x467   : > { %s1876_s20 = scalar_lea.vmem %s1875_s2, 256  ;;  %p1877_p4 = scmp.lt.s32.totalorder %s996_s10, %s1875_s2 }
 0x468   : > { %s1189_s3 = sshll.u32 %s2705_s13, 7  ;;  %p2708_p0 = scmp.ne.s32.totalorder %s2706_s4, 0 }
 0x469   : > { %s2582_s0 = scalar_lea.hbm %s2707_s17, %s1189_s3  ;;  %p1878_p6 = scmp.lt.s32.totalorder %s1876_s20, %s1870_s27 }
 0x46a   : > { %p1872_p7 = pnand %p1871_p10, %p2708_p0 }
 0x46b   : > { %p1879_p11 = por %p1878_p6, %p1877_p4 }
 0x46c   : > { %p1873_p13 = pneg %p1872_p7 }
 0x46e   : > { %p1880_p1 = pnand %p1879_p11, %p1873_p13 }
 0x470   : > { %1883 = shalt.err (!%p1880_p1)
}
 0x471   : > { %s1884_s16 = scalar_lea.hbm %s2582_s0, 128  ;;  %s1888_s6 = scalar_lea.hbm %s2707_s17, 256 }
 0x472   : > { %p1885_p3 = scmp.ne.s32.totalorder %s2582_s0, %s1884_s16  ;;  %p1889_p8 = scmp.lt.u32.totalorder %s2582_s0, %s2707_s17 }
 0x473   : > { %p1890_p12 = scmp.lt.u32.totalorder %s1888_s6, %s1884_s16  ;;  %p1892_p10 = scmp.lt.u32.totalorder %s1884_s16, %s2582_s0 }
 0x474   : > { %p1886_p9 = pnand %p1885_p3, %p2708_p0 }
 0x475   : > { %p1891_p2 = por %p1890_p12, %p1889_p8 }
 0x476   : > { %p1887_p5 = pneg %p1886_p9 }
 0x477   : > { %p1893_p7 = por %p1892_p10, %p1891_p2 }
 0x479   : > { %p1894_p13 = pnand %p1893_p7, %p1887_p5 }
 0x47b   : > { %1897 = shalt.err (!%p1894_p13)
}
 0x47c   : > { %1556 = dma.vmem_to_hbm [thread:$0]  (%p2708_p0), %s996_s10, 128, %s2582_s0, %s982_s5  }
 0x47d PF: > { %s2709_s14 = sld [smem:[#allocation22_spill]]  ;;  %s2710_s21 = sld [smem:[#allocation27_spill]] }
 0x47e   : > { %p1591_p4 = scmp.ge.s32.totalorder %s2008_s7, 2 }
 0x483   : > { %s1007_s24 = sand.u32 1, %s2709_s14   ;;  %p2711_p6 = scmp.ne.s32.totalorder %s2710_s21, 0 }
 0x484   : > { %s1008_s8 = scalar_lea.sflag [#allocation6], %s1007_s24 }
 0x485   : > { %p1579_p11 = pnand %p1591_p4, %p2711_p6 }
 0x487   : > { %1963 = dma.done.wait (!%p1579_p11), %s1008_s8, 128  }
 0x488   : > { %1965 = vsyncadd (!%p1579_p11), %s1008_s8, 4294967168  ;;  %s27_s7 = sadd.s32 1, %s2008_s7   ;;  %s2712_s13 = sld [smem:[#allocation23_spill]] }
 0x489   : > { %p24_p1 = scmp.ge.s32.totalorder %s27_s7, 6   ;;  %s2713_s26 = sld [smem:[#allocation30_spill]] }
 0x48a   : > { %s2714_s4 = sld [smem:[#allocation28_spill]]  ;;  %s2715_s3 = sld [smem:[#allocation29_spill]] }
 0x48b   : > { %s2716_s21 = smov %s1972_s22  ;;  %s2717_s22 = smov %s1976_s23 }
 0x48c   : > { %s2718_s23 = smov %s2279_s9  ;;  %s2719_s24 = smov %s1984_s25 }
 0x48d   : > { %s2721_s27 = smov %s2000_s29  ;;  %s2722_s28 = smov %s2004_s30 }
 0x48e   : > { %s2720_s25 = smov %s2712_s13  ;;  %26 = sbr.rel (!%p24_p1) target bundleno = 20 (0x14), region = 126 }
 0x490   : > { %s2723_s29 = smov %s2714_s4  ;;  %s2724_s30 = smov %s2715_s3 }
 0x495   :  { %1013 = vsyncpa [#allocation5], 1 }
 0x496   :  { %1015 = vsyncpa [#allocation5 + $0x1], 1 }
 0x497   :  { %1016 = vsyncpa [#allocation8], 1 }
 0x498   :  { %1018 = vsyncpa [#allocation8 + $0x1], 1 }
 0x499   :  { %1019 = vsyncpa [#allocation11], 1 }
 0x49a   :  { %1020 = vsyncpa [#allocation14], 1 }
 0x49b   :  { %1021 = vsyncpa [#allocation6], 1 }
 0x49c   :  { %1023 = vsyncpa [#allocation6 + $0x1], 1 }

</bundles_post_ra>
